<compile_context>
chip_gen: v5e
topology: v5e:2x2
jax: 0.10.0
libtpu: 0.0.40
codegen_flags: <defaults>
</compile_context>

<pallas_src>
import jax
import jax.numpy as jnp
from jax.experimental import pallas as pl
from jax.experimental.pallas import tpu as pltpu


_MIN_TL = 512          # below this HBM efficiency drops sharply (measured ~85% at 512)
_MAX_TL = 4096
_MIN_GRID_STEPS = 8    # keep both v7x TensorCores busy + DMA/compute overlap


def _conv1x1_bn_relu_kernel(x_ref, w_ref, b_ref, o_ref):
    # x_ref: (C_in, TL)  f32 activation slab (TL lanes of flattened H*W)
    # w_ref: (C_out, C_in) bf16 BN-folded 1x1 conv weight (resident across the grid)
    # b_ref: (C_out, 1)  f32 BN-folded bias
    # o_ref: (C_out, TL)
    x = x_ref[...].astype(w_ref.dtype)                                  # VPU cast -> bf16
    acc = jnp.dot(w_ref[...], x, preferred_element_type=jnp.float32)    # MXU, f32 accum
    acc = acc + b_ref[...]                                              # broadcast over lanes
    o_ref[...] = jnp.maximum(acc, 0.0).astype(o_ref.dtype)


def _vmem_capacity_bytes():
    try:
        return int(pltpu.get_tpu_info().vmem_capacity_bytes)
    except Exception:
        return 64 * 1024 * 1024   # conservative fallback: v7x per-TensorCore VMEM


def _pick_lane_tile(hw, n, c_in, c_out, x_bytes, o_bytes, block_budget):
    """Largest lane tile (multiple of 128, >= 512) whose double-buffered input+output
    blocks fit `block_budget`, while keeping >= _MIN_GRID_STEPS grid steps."""
    if hw <= _MIN_TL:
        return hw                                   # full extent: always a legal block
    per_lane = 2 * (c_in * x_bytes + c_out * o_bytes)   # dbl-buffered in+out, per lane
    tl = min(_MAX_TL, max(_MIN_TL, block_budget // per_lane), hw)
    tl = max(_MIN_TL, (tl // 128) * 128)            # lane-dense: multiple of 128
    # Keep enough grid steps for megacore sharding + pipelining (cheap: ~0.35us/step).
    while tl > _MIN_TL and n * ((hw + tl - 1) // tl) < _MIN_GRID_STEPS:
        tl -= 128
    return tl


def conv1x1_bn_relu(x, conv_w, conv_b, bn_gamma, bn_beta, bn_mean, bn_var, eps=1e-5):
    """y = ReLU(BatchNorm2d(Conv2d(x, kernel=1x1))) with BN in eval mode, folded into the conv.

    x:      (N, C_in, H, W) float32
    conv_w: (C_out, C_in, 1, 1)
    conv_b: (C_out,)
    bn_*:   (C_out,)
    returns (N, C_out, H, W) float32
    """
    # TODO(synk): BatchNorm2d is eval/inference mode only (running stats folded into the
    # conv); training-mode batch-statistic computation is not kernelized.
    N, C_in, H, W = x.shape
    C_out = conv_w.shape[0]
    HW = H * W

    # Fold BN into the conv: BN(Wx + b) = scale*(Wx + b - mean) + beta.
    scale = bn_gamma * jax.lax.rsqrt(bn_var + eps)                                   # (C_out,)
    w_eff = (conv_w.reshape(C_out, C_in) * scale[:, None]).astype(jnp.bfloat16)      # (C_out, C_in)
    b_eff = (scale * (conv_b - bn_mean) + bn_beta).reshape(C_out, 1).astype(jnp.float32)

    x3 = x.reshape(N, C_in, HW)   # free reshape: NCHW is contiguous over H*W

    x_bytes = x3.dtype.itemsize
    o_bytes = jnp.dtype(x.dtype).itemsize
    vmem_cap = _vmem_capacity_bytes()
    TL = _pick_lane_tile(HW, N, C_in, C_out, x_bytes, o_bytes, int(vmem_cap * 0.6))
    grid = (N, (HW + TL - 1) // TL)   # cdiv: last lane block may be partial (masked writes)
    # TODO(synk): for extreme C_in (working set > budget even at TL=512) add a K grid axis
    # over C_in with an f32 accumulator scratch instead of shrinking TL further.

    # Working set: double-buffered x/out blocks + single-buffered weight/bias
    # + in-kernel bf16 copy of x + f32 matmul result, with headroom.
    ws = (2 * (C_in * x_bytes + C_out * o_bytes) * TL
          + C_out * C_in * w_eff.dtype.itemsize
          + 2 * C_out * 4
          + C_in * TL * 2 + C_out * TL * 4)
    vmem_limit = min(int(vmem_cap * 0.9), max(32 * 1024 * 1024, int(ws * 1.5)))

    out = pl.pallas_call(
        _conv1x1_bn_relu_kernel,
        out_shape=jax.ShapeDtypeStruct((N, C_out, HW), x.dtype),
        grid_spec=pltpu.PrefetchScalarGridSpec(
            num_scalar_prefetch=0,
            grid=grid,
            in_specs=[
                pl.BlockSpec((pl.Squeezed(), C_in, TL), lambda n, l: (n, 0, l)),
                pl.BlockSpec((C_out, C_in), lambda n, l: (0, 0),
                             pipeline_mode=pl.Buffered(1)),
                pl.BlockSpec((C_out, 1), lambda n, l: (0, 0),
                             pipeline_mode=pl.Buffered(1)),
            ],
            out_specs=pl.BlockSpec((pl.Squeezed(), C_out, TL), lambda n, l: (n, 0, l)),
        ),
        compiler_params=pltpu.CompilerParams(
            dimension_semantics=("parallel", "parallel"),
            vmem_limit_bytes=vmem_limit),
    )(x3, w_eff, b_eff)
    return out.reshape(N, C_out, H, W)


def _reference(x, conv_w, conv_b, gamma, beta, mean, var, eps=1e-5):
    # pure-JAX reference: 1x1 conv -> eval-mode BN -> ReLU (validation only)
    C_out, C_in = conv_w.shape[0], conv_w.shape[1]
    y = jnp.einsum('nchw,oc->nohw', x, conv_w.reshape(C_out, C_in))
    y = y + conv_b[None, :, None, None]
    y = (y - mean[None, :, None, None]) * (gamma * jax.lax.rsqrt(var + eps))[None, :, None, None]
    y = y + beta[None, :, None, None]
    return jnp.maximum(y, 0.0)


def _run_case(key, N, C_in, C_out, H, W):
    ks = jax.random.split(key, 7)
    x      = jax.random.normal(ks[0], (N, C_in, H, W), dtype=jnp.float32)
    conv_w = 0.5 * jax.random.normal(ks[1], (C_out, C_in, 1, 1), dtype=jnp.float32)
    conv_b = 0.1 * jax.random.normal(ks[2], (C_out,), dtype=jnp.float32)
    gamma  = 1.0 + 0.1 * jax.random.normal(ks[3], (C_out,), dtype=jnp.float32)
    beta   = 0.1 * jax.random.normal(ks[4], (C_out,), dtype=jnp.float32)
    mean   = 0.1 * jax.random.normal(ks[5], (C_out,), dtype=jnp.float32)
    var    = jnp.abs(jax.random.normal(ks[6], (C_out,), dtype=jnp.float32)) + 0.5

    out = jax.block_until_ready(conv1x1_bn_relu(x, conv_w, conv_b, gamma, beta, mean, var))
    ref = _reference(x, conv_w, conv_b, gamma, beta, mean, var)
    assert out.shape == (N, C_out, H, W)
    # bf16 matmul inputs with f32 accumulation -> relaxed tolerance vs f32 reference.
    err = float(jnp.max(jnp.abs(out - ref)))
    assert jnp.allclose(out, ref, atol=7.5e-2, rtol=5e-2), f"max abs err {err}"


if __name__ == "__main__":
    key = jax.random.PRNGKey(0)
    k1, k2 = jax.random.split(key)
    # Small case (full-extent lane block, grid=(2,1)).
    _run_case(k1, N=2, C_in=4, C_out=8, H=16, W=16)
    # Larger case: exercises spatial tiling, the partial (masked) last lane block
    # (HW=900 -> TL=512, grid=(2,2)), and weight residency across a multi-step grid.
    _run_case(k2, N=2, C_in=16, C_out=32, H=30, W=30)
    print("KERNEL_OK")
</pallas_src>

<mosaic_0001>
module attributes {stable_mosaic.version = 11 : i64} {
  func.func @_conv1x1_bn_relu_kernel(%arg0: i32, %arg1: i32, %arg2: memref<1x4x256xf32, #tpu.memory_space<vmem>>, %arg3: memref<8x4xbf16, #tpu.memory_space<vmem>>, %arg4: memref<8x1xf32, #tpu.memory_space<vmem>>, %arg5: memref<1x8x256xf32, #tpu.memory_space<vmem>>) attributes {dimension_semantics = [#tpu.dimension_semantics<parallel>, #tpu.dimension_semantics<parallel>], iteration_bounds = array<i64: 2, 1>, scalar_prefetch = 0 : i64, scratch_operands = 0 : i64, tpu.core_type = #tpu.core_type<tc>, window_params = [{transform_indices = @transform_0, window_bounds = array<i64: 1, 4, 256>}, {pipeline_mode = #tpu.pipeline_mode<synchronous>, transform_indices = @transform_1, window_bounds = array<i64: 8, 4>}, {pipeline_mode = #tpu.pipeline_mode<synchronous>, transform_indices = @transform_2, window_bounds = array<i64: 8, 1>}, {transform_indices = @transform_3, window_bounds = array<i64: 1, 8, 256>}]} {
    %c0 = arith.constant 0 : index
    %c0_0 = arith.constant 0 : index
    %c0_1 = arith.constant 0 : index
    %0 = vector.load %arg2[%c0, %c0_0, %c0_1] : memref<1x4x256xf32, #tpu.memory_space<vmem>>, vector<1x4x256xf32>
    %1 = vector.shape_cast %0 : vector<1x4x256xf32> to vector<4x256xf32>
    %2 = arith.truncf %1 : vector<4x256xf32> to vector<4x256xbf16>
    %c0_2 = arith.constant 0 : index
    %c0_3 = arith.constant 0 : index
    %3 = vector.load %arg3[%c0_2, %c0_3] : memref<8x4xbf16, #tpu.memory_space<vmem>>, vector<8x4xbf16>
    %cst = arith.constant dense<0.000000e+00> : vector<8x256xf32>
    %4 = tpu.matmul %3, %2, %cst {dimension_numbers = #tpu.dot_dimension_numbers<[1], [0], [0], [1], [0, 0, 1, 1], [], []>} : vector<8x4xbf16>, vector<4x256xbf16>, vector<8x256xf32> -> vector<8x256xf32>
    %c0_4 = arith.constant 0 : index
    %c0_5 = arith.constant 0 : index
    %5 = vector.load %arg4[%c0_4, %c0_5] : memref<8x1xf32, #tpu.memory_space<vmem>>, vector<8x1xf32>
    %6 = vector.broadcast %5 : vector<8x1xf32> to vector<8x256xf32>
    %7 = arith.addf %4, %6 : vector<8x256xf32>
    %cst_6 = arith.constant 0.000000e+00 : f32
    %8 = vector.broadcast %cst_6 : f32 to vector<8x256xf32>
    %9 = arith.maximumf %7, %8 : vector<8x256xf32>
    %c0_7 = arith.constant 0 : index
    %c0_8 = arith.constant 0 : index
    %c0_9 = arith.constant 0 : index
    %10 = vector.load %arg5[%c0_7, %c0_8, %c0_9] : memref<1x8x256xf32, #tpu.memory_space<vmem>>, vector<1x8x256xf32>
    %11 = vector.shape_cast %10 : vector<1x8x256xf32> to vector<8x256xf32>
    %12 = vector.shape_cast %9 : vector<8x256xf32> to vector<1x8x256xf32>
    tpu.vector_store %arg5[%c0_7, %c0_8, %c0_9], %12 {strides = array<i32>} : memref<1x8x256xf32, #tpu.memory_space<vmem>>, vector<1x8x256xf32>,
    return
  }
  func.func @transform_0(%arg0: i32, %arg1: i32) -> (i32, i32, i32) {
    %c0_i32 = arith.constant 0 : i32
    %c0_i32_0 = arith.constant 0 : i32
    return %arg0, %c0_i32, %arg1 : i32, i32, i32
  }
  func.func @transform_1(%arg0: i32, %arg1: i32) -> (i32, i32) {
    %c0_i32 = arith.constant 0 : i32
    %c0_i32_0 = arith.constant 0 : i32
    %c0_i32_1 = arith.constant 0 : i32
    return %c0_i32, %c0_i32_0 : i32, i32
  }
  func.func @transform_2(%arg0: i32, %arg1: i32) -> (i32, i32) {
    %c0_i32 = arith.constant 0 : i32
    %c0_i32_0 = arith.constant 0 : i32
    %c0_i32_1 = arith.constant 0 : i32
    return %c0_i32, %c0_i32_0 : i32, i32
  }
  func.func @transform_3(%arg0: i32, %arg1: i32) -> (i32, i32, i32) {
    %c0_i32 = arith.constant 0 : i32
    %c0_i32_0 = arith.constant 0 : i32
    return %arg0, %c0_i32, %arg1 : i32, i32, i32
  }
}

</mosaic_0001>

<bundles_post_ra>
// kernel: tpu_custom_call.1
= control target key start
LH: loop header
LB: loop body
LE: loop exit
PB: predicated region body
PF: predicated region fallthrough
CT: control target
= control target key end

     0   :  { %8 = vsyncpa [#allocation3], 0  ;;  %s715_s0 = inlined_call_operand.hbm [shape: f32[2,4,256], index: 0, kind: input, shape index: {}]   ;;  %s716_s1 = inlined_call_operand.vmem [shape: bf16[8,4], index: 1, kind: input, shape index: {}]   ;;  %s717_s2 = inlined_call_operand.vmem [shape: f32[8,1], index: 2, kind: input, shape index: {}]   ;;  %s718_s3 = inlined_call_operand.hbm [shape: f32[2,8,256], index: 3, kind: output, shape index: {}]  }
   0x1   :  { %10 = vsyncpa [#allocation3 + $0x1], 0 }
   0x2   :  { %11 = vsyncpa [#allocation4], 0 }
   0x3   :  { %13 = vsyncpa [#allocation4 + $0x1], 0  ;;  %s588_s12 = smov 0   ;;  %s590_s13 = smov 0  }
   0x4   :  { %s592_s14 = smov 0   ;;  %s594_s15 = smov 0  }
   0x5   :  { %s596_s16 = smov 0   ;;  %s598_s17 = smov 0  }
   0x6 LB: > { %s370_s18 = sadd.s32 4294967295, %s565_s17   ;;  %s371_s19 = sadd.s32 4294967294, %s565_s17   ;;  %s565_s17 = sphi %s598_s17, %s19_s17   ;;  %s561_s16 = sphi %s596_s16, %s727_s16   ;;  %s557_s15 = sphi %s594_s15, %s726_s15   ;;  %s553_s14 = sphi %s592_s14, %s725_s14   ;;  %s549_s13 = sphi %s590_s13, %s724_s13   ;;  %s545_s12 = sphi %s588_s12, %s723_s12  }
   0x7   : > { %s31_s20 = sadd.s32 1, %s561_s16  ;;  %s40_s21 = sadd.s32 1, %s553_s14 }
   0x8   : > { %p33_p0 = scmp.ge.s32.totalorder %s31_s20, 2  ;;  %p47_p1 = scmp.ne.s32.totalorder %s553_s14, %s549_s13 }
   0x9   : > { %p48_p2 = scmp.eq.s32.totalorder %s565_s17, 0  ;;  %p53_p3 = scmp.ne.s32.totalorder %s549_s13, %s545_s12 }
   0xa   : > { %s729_s20 = smov (%p33_p0, %s31_s20), 0  ;;  %p54_p5 = scmp.eq.s32.totalorder %s370_s18, 0 }
   0xb   : > { %p629_p4 = por %p48_p2, %p47_p1  ;;  %s35_s23 = ssub.s32 %s561_s16, %s729_s20 }
   0xc   : > { %p121_p6 = scmp.eq.s32.totalorder %s370_s18, 1  ;;  %p38_p7 = scmp.eq.s32.totalorder %s35_s23, 0 }
   0xd   : > { %p635_p8 = por %p54_p5, %p53_p3  ;;  %p127_p10 = scmp.eq.s32.totalorder %s371_s19, 1 }
   0xe   : > { %p639_p9 = por %p121_p6, %p47_p1  ;;  %p373_p12 = scmp.ge.s32.totalorder %s565_s17, 2 }
   0xf   : > { %s644_s26 = scalar_select %p38_p7, %s553_s14, %s40_s21  }
  0x10   : > { %p646_p11 = por %p127_p10, %p53_p3  ;;  %p401_p13 = scmp.lt.s32.totalorder %s565_s17, 2 }
  0x11   : > { %s153_s28 = sand.u32 1, %s553_s14   ;;  %s387_s30 = sshll.u32 %s561_s16, 3 }
  0x12   : > { %s374_s29 = sshll.u32 %s153_s28, 3  ;;  %s164_s6 = scalar_lea.hbm %s715_s0, %s387_s30 }
  0x13   : > { %s157_s7 = scalar_lea.vmem [#allocation2], %s374_s29  ;;  %s166_s9 = sshll.u32 %s164_s6, 4  ;;  %s167_s9 = int_to_ptr.hbm [resolvable:$true] %s166_s9 }
  0x14   : > { %s168_s8 = sshll.u32 %s157_s7, 4  ;;  %p394_p0 = pnand %p401_p13, %p629_p4  ;;  %s169_s8 = int_to_ptr.vmem [resolvable:$true] %s168_s8 }
  0x15   : > { %p377_p1 = scmp.ge.s32.totalorder %s565_s17, 1  ;;  %p173_p2 = scmp.lt.s32.totalorder %s565_s17, 3 }
  0x16   : > { %s154_s10 = scalar_lea.sflag [#allocation3], %s153_s28 }
  0x17   : > { %396 = dma.hbm_to_vmem [thread:$0]  (!%p394_p0), %s167_s9, 128, %s169_s8, %s154_s10  }
  0x18   : > { %p174_p3 = pnand %p377_p1, %p173_p2 }
  0x19   : > { %s662_s11 = sand.u32 (!%p174_p3), 1, %s549_s13  }
  0x1a   : > { %177 = sbr.rel (%p174_p3) target bundleno = 181 (0xb5), region = 32  ;;  %s378_s18 = sshll.u32 (!%p174_p3), %s662_s11, 3 }
  0x1b   : > { %s180_s19 = scalar_lea.sflag (!%p174_p3), [#allocation3], %s662_s11  ;;  %s183_s21 = scalar_lea.vmem (!%p174_p3), [#allocation2], %s378_s18 }
  0x1f   : > { %536 = dma.done.wait (%p635_p8), %s180_s19, 128  }
  0x20   : > { %538 = vsyncadd (%p635_p8), %s180_s19, 4294967168  ;;  %v567_v0 = vmov 0   ;;  %v210_v1 = vld [vmem:[%s183_s21] sm:$0xff]  ;;  %v220_v2 = vld [vmem:[%s717_s2] sm:$0xff]  ;;  %vm230_vm0 = vcmask 1041408   ;;  %vm226_vm1 = vcmask 31744  }
  0x21   : > { %452 = vset.pattern.permute.xlu0 %v567_v0  ;;  %212 = vst [vmem:[#allocation1] ss:$2 sm:$0xff] %v210_v1  ;;  %v219_v9 = vld [vmem:[%s716_s1] sm:$0xf]  ;;  %s379_s29 = sshll.u32 %s662_s11, 4  ;;  %s388_s30 = sshll.u32 %s557_s15, 4 }
  0x22   : > { %223 = vperm.xlu0 %452, %v220_v2   ;;  %s281_s6 = scalar_lea.hbm %s718_s3, %s388_s30  ;;  %s206_s7 = scalar_lea.vmem [#allocation5], %s379_s29 }
  0x23   : > { %s283_s8 = sshll.u32 %s206_s7, 4  ;;  %s285_s9 = sshll.u32 %s281_s6, 4  ;;  %s284_s8 = int_to_ptr.vmem [resolvable:$true] %s283_s8  ;;  %s286_s9 = int_to_ptr.hbm [resolvable:$true] %s285_s9 }
  0x24   : > { %s268_s15 = scalar_lea.sflag [#allocation4], %s662_s11  ;;  %s497_s10 = sshra.s32 %s286_s9, 4  ;;  %s498_s10 = int_to_ptr.hbm [resolvable:$true] %s497_s10 }
  0x25   : > { %s499_s18 = scalar_lea.hbm %s498_s10, 16  ;;  %s503_s22 = scalar_lea.hbm %s718_s3, 32 }
  0x26   : > { %p500_p4 = scmp.ne.s32.totalorder %s498_s10, %s499_s18  ;;  %p504_p7 = scmp.lt.s32.totalorder %s498_s10, %s718_s3 }
  0x27   : > { %p505_p8 = scmp.lt.s32.totalorder %s503_s22, %s499_s18 }
  0x28   : > { %v213_v3 = vld.sshfl [vmem:[#allocation1] sm:$0xff pattern:$0x75316420]  ;;  %v214_v4 = vld.sshfl [vmem:[#allocation1 + $0x8] sm:$0xff pattern:$0x75316420]  ;;  %p501_p5 = pnand %p500_p4, %p639_p9 }
  0x29   : > { %v217_v5 = vpack.c.bf16 %v213_v3, %v213_v3  ;;  %v218_v6 = vpack.c.bf16 %v214_v4, %v214_v4  ;;  %p506_p10 = por %p505_p8, %p504_p7 }
  0x2a   : > { %p502_p6 = pneg %p501_p5 }
  0x2b   : > { %v232_v7 = vsel %vm230_vm0, %v217_v5, 0  ;;  %v235_v8 = vsel %vm230_vm0, %v218_v6, 0 }
  0x2c   : > { %244 = vmatpush.bf16.msra.mxu0 %v232_v7  ;;  %257 = vmatpush.bf16.msra.mxu1 %v235_v8  ;;  %p507_p13 = pnand %p506_p10, %p502_p6 }
  0x2f   : > { %380 = vmatmul.msk.bf16.vlgmr.msra.gmra.mxu0 %vm226_vm1, %v219_v9  ;;  %381 = vmatmul.msk.bf16.vlgmr.msra.gmra.mxu1 %vm226_vm1, %v219_v9 }
  0x94   : > { %v224_v10 = vpop.permute.xlu0 %223 }
  0xac   : > { %v246_v11 = vpop.f32.mrf.mxu0  ;;  %v259_v12 = vpop.f32.mrf.mxu1 }
  0xad   : > { %v247_v13 = vadd.f32 %v246_v11, %v224_v10  ;;  %v260_v14 = vadd.f32 %v259_v12, %v224_v10 }
  0xaf   : > { %v263_v15 = vmax.f32 %v247_v13, 0.0  ;;  %v264_v16 = vmax.f32 %v260_v14, 0.0 }
  0xb1   : > { %265 = vst [vmem:[%s206_s7] sm:$0xff] %v263_v15 }
  0xb2   : > { %266 = vst [vmem:[%s206_s7 + $0x8] sm:$0xff] %v264_v16 }
  0xb3   : > { %510 = shalt.err (!%p507_p13)
}
  0xb4   : > { %391 = dma.vmem_to_hbm [thread:$0]  (%p639_p9), %s284_s8, 256, %s286_s9, %s268_s15   ;;  %v248_v17 = vpop.f32.mrf.mxu0  ;;  %v261_v18 = vpop.f32.mrf.mxu1 }
  0xb5 PF: > { %s297_s11 = sand.u32 1, %s545_s12   ;;  %p398_p0 = pnand %p373_p12, %p646_p11 }
  0xb6   : > { %s298_s28 = scalar_lea.sflag [#allocation4], %s297_s11 }
  0xb7   : > { %p399_p1 = pneg %p398_p0 }
  0xb9   : > { %540 = dma.done.wait (%p399_p1), %s298_s28, 256  }
  0xba   : > { %542 = vsyncadd (%p399_p1), %s298_s28, 4294967040  ;;  %s19_s17 = sadd.s32 1, %s565_s17   ;;  %s723_s12 = smov %s549_s13 }
  0xbb   : > { %p16_p2 = scmp.ge.s32.totalorder %s19_s17, 4   ;;  %s724_s13 = smov %s553_s14 }
  0xbc   : > { %s725_s14 = smov %s644_s26  ;;  %s726_s15 = smov %s561_s16 }
  0xbd   : > { %s727_s16 = smov %s729_s20  ;;  %18 = sbr.rel (!%p16_p2) target bundleno = 6 (0x6), region = 77 }
  0xc2   :  { %304 = vsyncpa [#allocation3], 1 }
  0xc3   :  { %306 = vsyncpa [#allocation3 + $0x1], 1 }
  0xc4   :  { %307 = vsyncpa [#allocation4], 1 }
  0xc5   :  { %309 = vsyncpa [#allocation4 + $0x1], 1 }

</bundles_post_ra>
